<compile_context>
chip_gen: v6e
topology: v6e:2x2x1
jax: 0.10.0
libtpu: 0.0.40
codegen_flags: <defaults>
</compile_context>

<pallas_src>
import functools
import math
from typing import Iterable, List, Optional, Sequence

import jax
import jax.numpy as jnp
from jax import lax
from jax.experimental import pallas as pl
from jax.experimental.pallas import tpu as pltpu


# ---------------------------------------------------------------------------
# Generation-aware VMEM budget / tile target
# ---------------------------------------------------------------------------
def _vmem_budget():
    """Returns (vmem_limit_bytes, image_tile_target_bytes) for this TPU gen."""
    cap = None
    try:
        cap = getattr(pltpu.get_tpu_info(), "vmem_capacity_bytes", None)
    except Exception:
        cap = None
    if cap is None:
        cap = 64 * 1024 * 1024                       # conservative (v7x-safe)
    if cap >= 100 * 1024 * 1024:                     # v5e / v6e: 128 MiB VMEM
        return 100 * 1024 * 1024, 8 * 1024 * 1024
    return int(cap * 3 // 4), 4 * 1024 * 1024        # v7x: 64 MiB per TC


# ---------------------------------------------------------------------------
# Kernel 1: image statistics (L2 norm of the whole batch + total-variance)
# Input block: (tile_rows, H*W) -- each row is one flattened (H, W) image.
# ---------------------------------------------------------------------------
def _image_stats_kernel(mc_ref, mr_ref, md_ref, x_ref, l2_ref, tv_ref,
                        s_sq, s_d1, s_d2, s_d3, s_d4,
                        *, nc, tile_rows, group, img_w, ragged):
    step = pl.program_id(0)

    @pl.when(step == 0)
    def _init():
        for a in (s_sq, s_d1, s_d2, s_d3, s_d4):
            a[...] = jnp.zeros_like(a)

    x = x_ref[...].astype(jnp.float32)              # (tile_rows, L)
    L = x.shape[-1]
    if ragged:
        # Mask tail rows of the last (partial) block: where() so that stale /
        # NaN out-of-bounds data cannot poison the sums.
        row = lax.broadcasted_iota(jnp.int32, (x.shape[0], 1), 0)
        x = jnp.where(step * tile_rows + row < nc, x, 0.0)

    # Precomputed (1, L) masks (DMA'd once; constant block index).
    m_col = mc_ref[...]                             # j <  w-1
    m_row = mr_ref[...]                             # i <  h-1
    m_dia = md_ref[...]                             # both

    # Lane rotations (XLU): x_rk[:, p] == x[:, (p + k) % L]; wrap-around
    # positions are zeroed by the masks.
    x_r1 = pltpu.roll(x, L - 1, axis=1)             # x[:, p+1]
    x_rw = pltpu.roll(x, L - img_w, axis=1)         # x[:, p+w]

    def fold(acc_ref, v):
        # VPU-only partial sums: split rows into groups of `group` sublanes and
        # add over the leading axis; no cross-lane reduction per step.
        sq = v * v
        acc_ref[...] += jnp.sum(sq.reshape(-1, group, L), axis=0)

    fold(s_sq, x)
    fold(s_d1, (x - x_r1) * m_col)                  # x[i,j]   - x[i,j+1]
    fold(s_d3, (x_rw - x_r1) * m_dia)               # x[i+1,j] - x[i,j+1]
    fold(s_d2, (x - x_rw) * m_row)                  # x[i,j]   - x[i+1,j]
    x_rw1 = pltpu.roll(x, L - img_w - 1, axis=1)    # x[:, p+w+1]
    fold(s_d4, (x - x_rw1) * m_dia)                 # x[i,j]   - x[i+1,j+1]

    @pl.when(step == pl.num_programs(0) - 1)
    def _fin():
        # torch.norm == Frobenius norm = sqrt(sum of squares)
        l2_ref[...] = jnp.full((1, 1), jnp.sqrt(jnp.sum(s_sq[...])), jnp.float32)
        tv = (jnp.sqrt(jnp.sum(s_d1[...])) + jnp.sqrt(jnp.sum(s_d2[...]))
              + jnp.sqrt(jnp.sum(s_d3[...])) + jnp.sqrt(jnp.sum(s_d4[...])))
        tv_ref[...] = jnp.full((1, 1), tv, jnp.float32)


def image_stats(x_nchw: jax.Array, *, tile_rows: Optional[int] = None):
    """Returns (||x||_2, compute_var(x)) for an NCHW image batch."""
    n, c, h, w = x_nchw.shape
    nc, L = n * c, h * w
    x2 = x_nchw.reshape(nc, L)                      # free reshape, input dtype

    vmem_limit, tile_target = _vmem_budget()
    row_bytes = L * 4                               # size for the f32 working set
    if tile_rows is None:
        tile_rows = max(8, (tile_target // max(row_bytes, 1)) // 8 * 8)
    if tile_rows >= nc:
        tile_rows = nc                              # single block (full-dim exempt)
        group = 8 if nc % 8 == 0 else nc
    else:
        tile_rows = max(8, (tile_rows // 8) * 8)
        group = 8
    steps = -(-nc // tile_rows)
    ragged = (nc % tile_rows) != 0

    # Neighbour-validity masks, built once with integer arithmetic.
    p = jnp.arange(L, dtype=jnp.int32)
    m_col = ((p % w) < (w - 1)).astype(jnp.float32).reshape(1, L)
    m_row = (p < (h - 1) * w).astype(jnp.float32).reshape(1, L)
    m_dia = m_col * m_row

    const_spec = pl.BlockSpec((1, L), lambda i: (0, 0))
    l2, tv = pl.pallas_call(
        functools.partial(_image_stats_kernel, nc=nc, tile_rows=tile_rows,
                          group=group, img_w=w, ragged=ragged),
        out_shape=(jax.ShapeDtypeStruct((1, 1), jnp.float32),
                   jax.ShapeDtypeStruct((1, 1), jnp.float32)),
        grid_spec=pltpu.PrefetchScalarGridSpec(
            num_scalar_prefetch=0,
            grid=(steps,),
            in_specs=[const_spec, const_spec, const_spec,
                      pl.BlockSpec((tile_rows, L), lambda i: (i, 0))],
            out_specs=(pl.BlockSpec((1, 1), lambda i: (0, 0)),
                       pl.BlockSpec((1, 1), lambda i: (0, 0))),
            scratch_shapes=[pltpu.VMEM((group, L), jnp.float32)] * 5),
        compiler_params=pltpu.CompilerParams(
            dimension_semantics=("arbitrary",),
            vmem_limit_bytes=vmem_limit),
    )(m_col, m_row, m_dia, x2)
    return l2[0, 0], tv[0, 0]


# ---------------------------------------------------------------------------
# Kernel 2: fused (weighted) cross-entropy + Jenson-Shannon divergence.
# ---------------------------------------------------------------------------
def _ce_js_kernel(*refs, temp, n_rows, tile_n, group, compute_js, ragged):
    if compute_js:
        (t_ref, tgt_ref, w_ref, s_ref,
         ce_ref, js_ref, num_acc, den_acc, js_acc) = refs
    else:
        t_ref, tgt_ref, w_ref, ce_ref, num_acc, den_acc = refs
        s_ref = js_ref = js_acc = None

    step = pl.program_id(0)

    @pl.when(step == 0)
    def _init():
        num_acc[...] = jnp.zeros_like(num_acc)
        den_acc[...] = jnp.zeros_like(den_acc)
        if compute_js:
            js_acc[...] = jnp.zeros_like(js_acc)

    t = t_ref[...].astype(jnp.float32)              # (tile_n, K)
    tn, k = t.shape
    valid = None
    if ragged:
        row = lax.broadcasted_iota(jnp.int32, (tn, 1), 0)
        valid = (step * tile_n + row) < n_rows      # (tile_n, 1) bool
        t = jnp.where(valid, t, 0.0)

    tgt = tgt_ref[...]                              # (tile_n, 1) int32
    w = w_ref[...].astype(jnp.float32)              # (1, K)

    def fold(acc_ref, v):                           # VPU-only partial-sum fold
        acc_ref[...] += jnp.sum(v.reshape(-1, group, k), axis=0)

    # ----- weighted cross-entropy partial sums (single fused one-hot pass) ---
    m = jnp.max(t, axis=1, keepdims=True)
    lse = jnp.log(jnp.sum(jnp.exp(t - m), axis=1, keepdims=True)) + m
    col = lax.broadcasted_iota(jnp.int32, (tn, k), 1)
    onehot = col == tgt
    if ragged:
        onehot = jnp.logical_and(onehot, valid)
    # NOTE: out-of-range targets contribute 0 to both sums (PyTorch would raise).
    wo = jnp.where(onehot, w, 0.0)
    fold(num_acc, wo * (lse - t))
    fold(den_acc, wo)

    # ----- Jenson-Shannon divergence partial sum (log-domain lp1/lp2) --------
    if compute_js:
        s = s_ref[...].astype(jnp.float32)
        if ragged:
            s = jnp.where(valid, s, 0.0)
        inv_t = 1.0 / temp
        lo, hi = math.log(0.01), math.log(0.99)
        # Teacher: reuse the CE row max (max(t/T) == max(t)/T for T > 0).
        zt = (t - m) * inv_t
        e1 = jnp.exp(zt)
        z1 = jnp.sum(e1, axis=1, keepdims=True)
        p1 = e1 * pl.reciprocal(z1, approx=True)
        lp1 = jnp.clip(zt - jnp.log(z1), lo, hi)    # == log(clip(softmax,.01,.99))
        # Student.
        zs = (s - jnp.max(s, axis=1, keepdims=True)) * inv_t
        e2 = jnp.exp(zs)
        z2 = jnp.sum(e2, axis=1, keepdims=True)
        p2 = e2 * pl.reciprocal(z2, approx=True)
        lp2 = jnp.clip(zs - jnp.log(z2), lo, hi)

        pmc = jnp.clip(0.5 * (p1 + p2), 0.01, 0.99)
        part = pmc * (jnp.log(pmc) - 0.5 * (lp1 + lp2))
        if ragged:
            part = jnp.where(valid, part, 0.0)
        fold(js_acc, part)

    @pl.when(step == pl.num_programs(0) - 1)
    def _fin():
        ce = jnp.sum(num_acc[...]) / jnp.sum(den_acc[...])
        ce_ref[...] = jnp.full((1, 1), ce, jnp.float32)
        if compute_js:
            js = jnp.clip(jnp.sum(js_acc[...]) * (1.0 / n_rows), 0.0, 1.0)
            js_ref[...] = jnp.full((1, 1), js, jnp.float32)


def ce_js_loss(teacher: jax.Array, targets: jax.Array,
               weights: Optional[jax.Array] = None,
               student: Optional[jax.Array] = None, *,
               softmax_temp: float = 3.0, tile_n: Optional[int] = None):
    """Returns (cross_entropy(teacher, targets; weights), JS(teacher, student))."""
    n, k = teacher.shape
    compute_js = student is not None
    if weights is None:
        weights = jnp.ones((k,), jnp.float32)       # plain mean reduction
    else:
        weights = jnp.asarray(weights, jnp.float32)
    tgt = targets.astype(jnp.int32).reshape(n, 1)

    vmem_limit, _ = _vmem_budget()
    if tile_n is None:                              # ~2 MiB logits blocks
        tile_n = max(8, ((2 * 1024 * 1024) // max(k * 4, 1)) // 8 * 8)
    if tile_n >= n:
        tile_n = n                                  # single block
        group = 8 if n % 8 == 0 else n
    else:
        tile_n = max(8, (tile_n // 8) * 8)
        group = 8
    steps = -(-n // tile_n)
    ragged = (n % tile_n) != 0

    kern = functools.partial(_ce_js_kernel, temp=float(softmax_temp),
                             n_rows=n, tile_n=tile_n, group=group,
                             compute_js=compute_js, ragged=ragged)

    in_specs = [pl.BlockSpec((tile_n, k), lambda i: (i, 0)),
                pl.BlockSpec((tile_n, 1), lambda i: (i, 0)),
                pl.BlockSpec((1, k), lambda i: (0, 0))]
    args = [teacher, tgt, weights.reshape(1, k)]
    scratch = [pltpu.VMEM((group, k), jnp.float32)] * 2
    if compute_js:                                  # only DMA the student if used
        in_specs.append(pl.BlockSpec((tile_n, k), lambda i: (i, 0)))
        args.append(student)
        scratch = scratch + [pltpu.VMEM((group, k), jnp.float32)]
        out_shape = (jax.ShapeDtypeStruct((1, 1), jnp.float32),
                     jax.ShapeDtypeStruct((1, 1), jnp.float32))
        out_specs = (pl.BlockSpec((1, 1), lambda i: (0, 0)),
                     pl.BlockSpec((1, 1), lambda i: (0, 0)))
    else:
        out_shape = jax.ShapeDtypeStruct((1, 1), jnp.float32)
        out_specs = pl.BlockSpec((1, 1), lambda i: (0, 0))

    res = pl.pallas_call(
        kern,
        out_shape=out_shape,
        grid_spec=pltpu.PrefetchScalarGridSpec(
            num_scalar_prefetch=0,
            grid=(steps,),
            in_specs=in_specs,
            out_specs=out_specs,
            scratch_shapes=scratch),
        compiler_params=pltpu.CompilerParams(
            dimension_semantics=("arbitrary",),
            vmem_limit_bytes=vmem_limit),
    )(*args)
    if compute_js:
        ce, js = res
        return ce[0, 0], js[0, 0]
    return res[0, 0], jnp.float32(0.0)


# ---------------------------------------------------------------------------
# ADILoss forward (glue around the Pallas kernels)
# ---------------------------------------------------------------------------
def adi_loss(inputs: jax.Array,
             targets: jax.Array,
             teacher_output: jax.Array,
             teacher_bns: Optional[List[jax.Array]] = None,
             student_output: Optional[jax.Array] = None,
             *,
             l2_scale: float = 0.0,
             var_scale: float = 5e-5,
             bn_scale: float = 10.0,
             comp_scale: float = 0.0,
             softmax_temp: float = 3.0,
             classes: Optional[Iterable[int]] = None,
             weights: Optional[Sequence[float]] = None,
             image_tile_rows: Optional[int] = None,
             logits_tile_n: Optional[int] = None) -> jax.Array:
    if classes:
        cls = sorted(tuple(set(classes)))
        idx = jnp.asarray(cls, jnp.int32)
        teacher_output = jnp.take(teacher_output, idx, axis=1)
        if student_output is not None:
            student_output = jnp.take(student_output, idx, axis=1)
        t = targets
        for i, c in enumerate(cls):                 # same sequential remap as PyTorch
            t = jnp.where(t == c, i, t)
        targets = t

    w = None if weights is None else jnp.asarray(weights, jnp.float32)
    use_js = comp_scale > 0.0 and student_output is not None
    ce, js = ce_js_loss(teacher_output, targets, w,
                        student_output if use_js else None,
                        softmax_temp=softmax_temp, tile_n=logits_tile_n)
    loss = ce

    if l2_scale > 0.0 or var_scale > 0.0:
        l2_norm, tv = image_stats(inputs, tile_rows=image_tile_rows)
        if l2_scale > 0.0:
            loss = loss + l2_scale * l2_norm
        if var_scale > 0.0:
            loss = loss + var_scale * tv
    if bn_scale > 0.0:
        assert teacher_bns is not None
        bn_sum = jnp.asarray(0.0, jnp.float32)      # scalar glue, no hot path
        for b in teacher_bns:
            bn_sum = bn_sum + jnp.asarray(b, jnp.float32)
        loss = loss + bn_scale * bn_sum
    if comp_scale > 0.0:
        assert student_output is not None
        loss = loss + comp_scale * (1.0 - js)
    return loss


# ---------------------------------------------------------------------------
# Pure-JAX reference (sanity check)
# ---------------------------------------------------------------------------
def _adi_loss_ref(inputs, targets, teacher_output, teacher_bns, student_output,
                  l2_scale, var_scale, bn_scale, comp_scale, softmax_temp,
                  weights=None):
    n, k = teacher_output.shape
    logp = jax.nn.log_softmax(teacher_output, axis=1)
    nll = -jnp.take_along_axis(logp, targets[:, None], axis=1)[:, 0]
    if weights is None:
        ce = jnp.mean(nll)
    else:
        wrow = jnp.asarray(weights, jnp.float32)[targets]
        ce = jnp.sum(wrow * nll) / jnp.sum(wrow)
    loss = ce
    if l2_scale > 0.0:
        loss += l2_scale * jnp.sqrt(jnp.sum(inputs * inputs))
    if var_scale > 0.0:
        x = inputs
        d1 = x[:, :, :, :-1] - x[:, :, :, 1:]
        d2 = x[:, :, :-1, :] - x[:, :, 1:, :]
        d3 = x[:, :, 1:, :-1] - x[:, :, :-1, 1:]
        d4 = x[:, :, :-1, :-1] - x[:, :, 1:, 1:]
        tv = sum(jnp.sqrt(jnp.sum(d * d)) for d in (d1, d2, d3, d4))
        loss += var_scale * tv
    if bn_scale > 0.0:
        loss += bn_scale * sum(teacher_bns)
    if comp_scale > 0.0:
        p1 = jax.nn.softmax(teacher_output / softmax_temp, axis=1)
        p2 = jax.nn.softmax(student_output / softmax_temp, axis=1)
        pm = 0.5 * (p1 + p2)
        p1c, p2c, pmc = (jnp.clip(p, 0.01, 0.99) for p in (p1, p2, pm))
        kl = lambda lp, q: jnp.sum(q * (jnp.log(q) - lp)) / n
        jsd = 0.5 * (kl(jnp.log(p1c), pmc) + kl(jnp.log(p2c), pmc))
        jsd = jnp.clip(jsd, 0.0, 1.0)
        loss += comp_scale * (1.0 - jsd)
    return loss


if __name__ == "__main__":
    key = jax.random.PRNGKey(0)
    k1, k2, k3, k4, k5 = jax.random.split(key, 5)

    # N*C = 40 image rows; N = 10 logit rows.  Explicit tiles of 16 / 8 below
    # produce ragged last blocks, exercising the in-kernel tail masking.
    N, C, H, W, K = 10, 4, 16, 16, 10
    inputs = jax.random.normal(k1, (N, C, H, W), jnp.float32)
    teacher_output = jax.random.normal(k2, (N, K), jnp.float32)
    student_output = jax.random.normal(k3, (N, K), jnp.float32)
    targets = jax.random.randint(k4, (N,), 0, K, jnp.int32)
    class_weights = jax.random.uniform(k5, (K,), jnp.float32, 0.5, 1.5)
    teacher_bns = [jnp.asarray(v, jnp.float32) for v in (0.125, 0.5, 0.875)]

    scales = dict(l2_scale=0.01, var_scale=5e-5, bn_scale=10.0,
                  comp_scale=0.5, softmax_temp=3.0)

    # Check 1: forced small tiles -> multi-step grids with ragged last tiles.
    loss = adi_loss(inputs, targets, teacher_output, teacher_bns, student_output,
                    image_tile_rows=16, logits_tile_n=8, **scales)
    loss = jax.block_until_ready(loss)
    ref = _adi_loss_ref(inputs, targets, teacher_output, teacher_bns,
                        student_output, **scales)
    assert jnp.allclose(loss, ref, rtol=1e-3, atol=1e-3), (float(loss), float(ref))

    # Check 2: weighted cross-entropy, automatic (single-block) tiles.
    loss_w = adi_loss(inputs, targets, teacher_output, teacher_bns,
                      student_output, weights=class_weights, **scales)
    loss_w = jax.block_until_ready(loss_w)
    ref_w = _adi_loss_ref(inputs, targets, teacher_output, teacher_bns,
                          student_output, weights=class_weights, **scales)
    assert jnp.allclose(loss_w, ref_w, rtol=1e-3, atol=1e-3), (float(loss_w),
                                                               float(ref_w))

    # Check 3: CE-only path (comp_scale=0, no student input DMA'd at all).
    scales_nojs = dict(scales, comp_scale=0.0)
    loss_n = adi_loss(inputs, targets, teacher_output, teacher_bns, None,
                      logits_tile_n=8, **scales_nojs)
    loss_n = jax.block_until_ready(loss_n)
    ref_n = _adi_loss_ref(inputs, targets, teacher_output, teacher_bns, None,
                          **scales_nojs)
    assert jnp.allclose(loss_n, ref_n, rtol=1e-3, atol=1e-3), (float(loss_n),
                                                               float(ref_n))

    print("KERNEL_OK")
</pallas_src>

<mosaic_0001>
module attributes {stable_mosaic.version = 11 : i64} {
  func.func @_ce_js_kernel(%arg0: i32, %arg1: memref<8x10xf32, #tpu.memory_space<vmem>>, %arg2: memref<8x1xi32, #tpu.memory_space<vmem>>, %arg3: memref<1x10xf32, #tpu.memory_space<vmem>>, %arg4: memref<8x10xf32, #tpu.memory_space<vmem>>, %arg5: memref<1x1xf32, #tpu.memory_space<vmem>>, %arg6: memref<1x1xf32, #tpu.memory_space<vmem>>, %arg7: memref<8x10xf32, #tpu.memory_space<vmem>>, %arg8: memref<8x10xf32, #tpu.memory_space<vmem>>, %arg9: memref<8x10xf32, #tpu.memory_space<vmem>>) attributes {dimension_semantics = [#tpu.dimension_semantics<arbitrary>], iteration_bounds = array<i64: 2>, scalar_prefetch = 0 : i64, scratch_operands = 3 : i64, tpu.core_type = #tpu.core_type<tc>, window_params = [{transform_indices = @transform_0, window_bounds = array<i64: 8, 10>}, {transform_indices = @transform_1, window_bounds = array<i64: 8, 1>}, {pipeline_mode = #tpu.pipeline_mode<synchronous>, transform_indices = @transform_2, window_bounds = array<i64: 1, 10>}, {transform_indices = @transform_3, window_bounds = array<i64: 8, 10>}, {pipeline_mode = #tpu.pipeline_mode<synchronous>, transform_indices = @transform_4, window_bounds = array<i64: 1, 1>}, {pipeline_mode = #tpu.pipeline_mode<synchronous>, transform_indices = @transform_5, window_bounds = array<i64: 1, 1>}]} {
    %c0_i32 = arith.constant 0 : i32
    %0 = arith.cmpi eq, %arg0, %c0_i32 : i32
    %1 = arith.extui %0 : i1 to i32
    %c0_i32_0 = arith.constant 0 : i32
    %2 = arith.cmpi ne, %1, %c0_i32_0 : i32
    scf.if %2 {
      %cst_42 = arith.constant 0.000000e+00 : f32
      %113 = vector.broadcast %cst_42 : f32 to vector<8x10xf32>
      %c0_43 = arith.constant 0 : index
      %c0_44 = arith.constant 0 : index
      %114 = vector.load %arg7[%c0_43, %c0_44] : memref<8x10xf32, #tpu.memory_space<vmem>>, vector<8x10xf32>
      tpu.vector_store %arg7[%c0_43, %c0_44], %113 {strides = array<i32>} : memref<8x10xf32, #tpu.memory_space<vmem>>, vector<8x10xf32>,
      %cst_45 = arith.constant 0.000000e+00 : f32
      %115 = vector.broadcast %cst_45 : f32 to vector<8x10xf32>
      %c0_46 = arith.constant 0 : index
      %c0_47 = arith.constant 0 : index
      %116 = vector.load %arg8[%c0_46, %c0_47] : memref<8x10xf32, #tpu.memory_space<vmem>>, vector<8x10xf32>
      tpu.vector_store %arg8[%c0_46, %c0_47], %115 {strides = array<i32>} : memref<8x10xf32, #tpu.memory_space<vmem>>, vector<8x10xf32>,
      %cst_48 = arith.constant 0.000000e+00 : f32
      %117 = vector.broadcast %cst_48 : f32 to vector<8x10xf32>
      %c0_49 = arith.constant 0 : index
      %c0_50 = arith.constant 0 : index
      %118 = vector.load %arg9[%c0_49, %c0_50] : memref<8x10xf32, #tpu.memory_space<vmem>>, vector<8x10xf32>
      tpu.vector_store %arg9[%c0_49, %c0_50], %117 {strides = array<i32>} : memref<8x10xf32, #tpu.memory_space<vmem>>, vector<8x10xf32>,
    } else {
    }
    %c0 = arith.constant 0 : index
    %c0_1 = arith.constant 0 : index
    %3 = vector.load %arg1[%c0, %c0_1] : memref<8x10xf32, #tpu.memory_space<vmem>>, vector<8x10xf32>
    %4 = tpu.iota {dimensions = array<i32: 0>} : vector<8x1xi32>
    %c8_i32 = arith.constant 8 : i32
    %5 = arith.muli %arg0, %c8_i32 : i32
    %6 = vector.broadcast %5 : i32 to vector<8x1xi32>
    %7 = arith.addi %6, %4 : vector<8x1xi32>
    %c10_i32 = arith.constant 10 : i32
    %8 = vector.broadcast %c10_i32 : i32 to vector<8x1xi32>
    %9 = arith.cmpi slt, %7, %8 : vector<8x1xi32>
    %cst = arith.constant 0.000000e+00 : f32
    %10 = vector.shape_cast %9 : vector<8x1xi1> to vector<8x1xi1>
    %11 = vector.broadcast %10 : vector<8x1xi1> to vector<8x10xi1>
    %12 = vector.broadcast %cst : f32 to vector<8x10xf32>
    %13 = arith.select %11, %3, %12 : vector<8x10xi1>, vector<8x10xf32>
    %c0_2 = arith.constant 0 : index
    %c0_3 = arith.constant 0 : index
    %14 = vector.load %arg2[%c0_2, %c0_3] : memref<8x1xi32, #tpu.memory_space<vmem>>, vector<8x1xi32>
    %c0_4 = arith.constant 0 : index
    %c0_5 = arith.constant 0 : index
    %15 = vector.load %arg3[%c0_4, %c0_5] : memref<1x10xf32, #tpu.memory_space<vmem>>, vector<1x10xf32>
    %cst_6 = arith.constant dense<0xFF800000> : vector<8xf32>
    %16 = vector.multi_reduction <maximumf>, %13, %cst_6 [1] : vector<8x10xf32> to vector<8xf32>
    %17 = vector.shape_cast %16 : vector<8xf32> to vector<8x1xf32>
    %18 = vector.broadcast %17 : vector<8x1xf32> to vector<8x10xf32>
    %19 = arith.subf %13, %18 : vector<8x10xf32>
    %20 = math.exp %19 : vector<8x10xf32>
    %cst_7 = arith.constant dense<0.000000e+00> : vector<8xf32>
    %21 = vector.multi_reduction <add>, %20, %cst_7 [1] : vector<8x10xf32> to vector<8xf32>
    %22 = vector.shape_cast %21 : vector<8xf32> to vector<8x1xf32>
    %23 = math.log %22 : vector<8x1xf32>
    %24 = arith.addf %23, %17 : vector<8x1xf32>
    %25 = tpu.iota {dimensions = array<i32: 1>} : vector<8x10xi32>
    %26 = vector.broadcast %14 : vector<8x1xi32> to vector<8x10xi32>
    %27 = arith.cmpi eq, %25, %26 : vector<8x10xi32>
    %28 = vector.broadcast %9 : vector<8x1xi1> to vector<8x10xi1>
    %29 = arith.andi %27, %28 : vector<8x10xi1>
    %cst_8 = arith.constant 0.000000e+00 : f32
    %30 = vector.shape_cast %15 : vector<1x10xf32> to vector<1x10xf32>
    %31 = vector.broadcast %30 : vector<1x10xf32> to vector<8x10xf32>
    %32 = vector.broadcast %cst_8 : f32 to vector<8x10xf32>
    %33 = arith.select %29, %31, %32 : vector<8x10xi1>, vector<8x10xf32>
    %34 = vector.broadcast %24 : vector<8x1xf32> to vector<8x10xf32>
    %35 = arith.subf %34, %13 : vector<8x10xf32>
    %36 = arith.mulf %33, %35 : vector<8x10xf32>
    %c0_9 = arith.constant 0 : index
    %c0_10 = arith.constant 0 : index
    %37 = vector.load %arg7[%c0_9, %c0_10] : memref<8x10xf32, #tpu.memory_space<vmem>>, vector<8x10xf32>
    %38 = vector.shape_cast %36 : vector<8x10xf32> to vector<1x8x10xf32>
    %cst_11 = arith.constant dense<0.000000e+00> : vector<8x10xf32>
    %39 = vector.multi_reduction <add>, %38, %cst_11 [0] : vector<1x8x10xf32> to vector<8x10xf32>
    %40 = arith.addf %37, %39 : vector<8x10xf32>
    %c0_12 = arith.constant 0 : index
    %c0_13 = arith.constant 0 : index
    %41 = vector.load %arg7[%c0_12, %c0_13] : memref<8x10xf32, #tpu.memory_space<vmem>>, vector<8x10xf32>
    tpu.vector_store %arg7[%c0_12, %c0_13], %40 {strides = array<i32>} : memref<8x10xf32, #tpu.memory_space<vmem>>, vector<8x10xf32>,
    %c0_14 = arith.constant 0 : index
    %c0_15 = arith.constant 0 : index
    %42 = vector.load %arg8[%c0_14, %c0_15] : memref<8x10xf32, #tpu.memory_space<vmem>>, vector<8x10xf32>
    %43 = vector.shape_cast %33 : vector<8x10xf32> to vector<1x8x10xf32>
    %cst_16 = arith.constant dense<0.000000e+00> : vector<8x10xf32>
    %44 = vector.multi_reduction <add>, %43, %cst_16 [0] : vector<1x8x10xf32> to vector<8x10xf32>
    %45 = arith.addf %42, %44 : vector<8x10xf32>
    %c0_17 = arith.constant 0 : index
    %c0_18 = arith.constant 0 : index
    %46 = vector.load %arg8[%c0_17, %c0_18] : memref<8x10xf32, #tpu.memory_space<vmem>>, vector<8x10xf32>
    tpu.vector_store %arg8[%c0_17, %c0_18], %45 {strides = array<i32>} : memref<8x10xf32, #tpu.memory_space<vmem>>, vector<8x10xf32>,
    %c0_19 = arith.constant 0 : index
    %c0_20 = arith.constant 0 : index
    %47 = vector.load %arg4[%c0_19, %c0_20] : memref<8x10xf32, #tpu.memory_space<vmem>>, vector<8x10xf32>
    %cst_21 = arith.constant 0.000000e+00 : f32
    %48 = vector.shape_cast %9 : vector<8x1xi1> to vector<8x1xi1>
    %49 = vector.broadcast %48 : vector<8x1xi1> to vector<8x10xi1>
    %50 = vector.broadcast %cst_21 : f32 to vector<8x10xf32>
    %51 = arith.select %49, %47, %50 : vector<8x10xi1>, vector<8x10xf32>
    %52 = vector.broadcast %17 : vector<8x1xf32> to vector<8x10xf32>
    %53 = arith.subf %13, %52 : vector<8x10xf32>
    %cst_22 = arith.constant 0.333333343 : f32
    %54 = vector.broadcast %cst_22 : f32 to vector<8x10xf32>
    %55 = arith.mulf %53, %54 : vector<8x10xf32>
    %56 = math.exp %55 : vector<8x10xf32>
    %cst_23 = arith.constant dense<0.000000e+00> : vector<8xf32>
    %57 = vector.multi_reduction <add>, %56, %cst_23 [1] : vector<8x10xf32> to vector<8xf32>
    %58 = vector.shape_cast %57 : vector<8xf32> to vector<8x1xf32>
    %59 = tpu.reciprocal %58 {approx = true} : vector<8x1xf32> -> vector<8x1xf32>
    %60 = vector.broadcast %59 : vector<8x1xf32> to vector<8x10xf32>
    %61 = arith.mulf %56, %60 : vector<8x10xf32>
    %62 = math.log %58 : vector<8x1xf32>
    %63 = vector.broadcast %62 : vector<8x1xf32> to vector<8x10xf32>
    %64 = arith.subf %55, %63 : vector<8x10xf32>
    %cst_24 = arith.constant -4.60517025 : f32
    %cst_25 = arith.constant -0.0100503359 : f32
    %65 = vector.broadcast %cst_24 : f32 to vector<8x10xf32>
    %66 = arith.maximumf %65, %64 : vector<8x10xf32>
    %67 = vector.broadcast %cst_25 : f32 to vector<8x10xf32>
    %68 = arith.minimumf %67, %66 : vector<8x10xf32>
    %cst_26 = arith.constant dense<0xFF800000> : vector<8xf32>
    %69 = vector.multi_reduction <maximumf>, %51, %cst_26 [1] : vector<8x10xf32> to vector<8xf32>
    %70 = vector.shape_cast %69 : vector<8xf32> to vector<8x1xf32>
    %71 = vector.broadcast %70 : vector<8x1xf32> to vector<8x10xf32>
    %72 = arith.subf %51, %71 : vector<8x10xf32>
    %cst_27 = arith.constant 0.333333343 : f32
    %73 = vector.broadcast %cst_27 : f32 to vector<8x10xf32>
    %74 = arith.mulf %72, %73 : vector<8x10xf32>
    %75 = math.exp %74 : vector<8x10xf32>
    %cst_28 = arith.constant dense<0.000000e+00> : vector<8xf32>
    %76 = vector.multi_reduction <add>, %75, %cst_28 [1] : vector<8x10xf32> to vector<8xf32>
    %77 = vector.shape_cast %76 : vector<8xf32> to vector<8x1xf32>
    %78 = tpu.reciprocal %77 {approx = true} : vector<8x1xf32> -> vector<8x1xf32>
    %79 = vector.broadcast %78 : vector<8x1xf32> to vector<8x10xf32>
    %80 = arith.mulf %75, %79 : vector<8x10xf32>
    %81 = math.log %77 : vector<8x1xf32>
    %82 = vector.broadcast %81 : vector<8x1xf32> to vector<8x10xf32>
    %83 = arith.subf %74, %82 : vector<8x10xf32>
    %cst_29 = arith.constant -4.60517025 : f32
    %cst_30 = arith.constant -0.0100503359 : f32
    %84 = vector.broadcast %cst_29 : f32 to vector<8x10xf32>
    %85 = arith.maximumf %84, %83 : vector<8x10xf32>
    %86 = vector.broadcast %cst_30 : f32 to vector<8x10xf32>
    %87 = arith.minimumf %86, %85 : vector<8x10xf32>
    %88 = arith.addf %61, %80 : vector<8x10xf32>
    %cst_31 = arith.constant 5.000000e-01 : f32
    %89 = vector.broadcast %cst_31 : f32 to vector<8x10xf32>
    %90 = arith.mulf %89, %88 : vector<8x10xf32>
    %cst_32 = arith.constant 0.00999999977 : f32
    %cst_33 = arith.constant 9.900000e-01 : f32
    %91 = vector.broadcast %cst_32 : f32 to vector<8x10xf32>
    %92 = arith.maximumf %91, %90 : vector<8x10xf32>
    %93 = vector.broadcast %cst_33 : f32 to vector<8x10xf32>
    %94 = arith.minimumf %93, %92 : vector<8x10xf32>
    %95 = math.log %94 : vector<8x10xf32>
    %96 = arith.addf %68, %87 : vector<8x10xf32>
    %cst_34 = arith.constant 5.000000e-01 : f32
    %97 = vector.broadcast %cst_34 : f32 to vector<8x10xf32>
    %98 = arith.mulf %97, %96 : vector<8x10xf32>
    %99 = arith.subf %95, %98 : vector<8x10xf32>
    %100 = arith.mulf %94, %99 : vector<8x10xf32>
    %cst_35 = arith.constant 0.000000e+00 : f32
    %101 = vector.shape_cast %9 : vector<8x1xi1> to vector<8x1xi1>
    %102 = vector.broadcast %101 : vector<8x1xi1> to vector<8x10xi1>
    %103 = vector.broadcast %cst_35 : f32 to vector<8x10xf32>
    %104 = arith.select %102, %100, %103 : vector<8x10xi1>, vector<8x10xf32>
    %c0_36 = arith.constant 0 : index
    %c0_37 = arith.constant 0 : index
    %105 = vector.load %arg9[%c0_36, %c0_37] : memref<8x10xf32, #tpu.memory_space<vmem>>, vector<8x10xf32>
    %106 = vector.shape_cast %104 : vector<8x10xf32> to vector<1x8x10xf32>
    %cst_38 = arith.constant dense<0.000000e+00> : vector<8x10xf32>
    %107 = vector.multi_reduction <add>, %106, %cst_38 [0] : vector<1x8x10xf32> to vector<8x10xf32>
    %108 = arith.addf %105, %107 : vector<8x10xf32>
    %c0_39 = arith.constant 0 : index
    %c0_40 = arith.constant 0 : index
    %109 = vector.load %arg9[%c0_39, %c0_40] : memref<8x10xf32, #tpu.memory_space<vmem>>, vector<8x10xf32>
    tpu.vector_store %arg9[%c0_39, %c0_40], %108 {strides = array<i32>} : memref<8x10xf32, #tpu.memory_space<vmem>>, vector<8x10xf32>,
    %c1_i32 = arith.constant 1 : i32
    %110 = arith.cmpi eq, %arg0, %c1_i32 : i32
    %111 = arith.extui %110 : i1 to i32
    %c0_i32_41 = arith.constant 0 : i32
    %112 = arith.cmpi ne, %111, %c0_i32_41 : i32
    scf.if %112 {
      %c0_42 = arith.constant 0 : index
      %c0_43 = arith.constant 0 : index
      %113 = vector.load %arg7[%c0_42, %c0_43] : memref<8x10xf32, #tpu.memory_space<vmem>>, vector<8x10xf32>
      %114 = vector.shape_cast %113 : vector<8x10xf32> to vector<1x8x10xf32>
      %cst_44 = arith.constant dense<0.000000e+00> : vector<1xf32>
      %115 = vector.multi_reduction <add>, %114, %cst_44 [1, 2] : vector<1x8x10xf32> to vector<1xf32>
      %116 = vector.shape_cast %115 : vector<1xf32> to vector<1x1x1xf32>
      %117 = vector.extract %116[0, 0, 0] : f32 from vector<1x1x1xf32>
      %c0_45 = arith.constant 0 : index
      %c0_46 = arith.constant 0 : index
      %118 = vector.load %arg8[%c0_45, %c0_46] : memref<8x10xf32, #tpu.memory_space<vmem>>, vector<8x10xf32>
      %119 = vector.shape_cast %118 : vector<8x10xf32> to vector<1x8x10xf32>
      %cst_47 = arith.constant dense<0.000000e+00> : vector<1xf32>
      %120 = vector.multi_reduction <add>, %119, %cst_47 [1, 2] : vector<1x8x10xf32> to vector<1xf32>
      %121 = vector.shape_cast %120 : vector<1xf32> to vector<1x1x1xf32>
      %122 = vector.extract %121[0, 0, 0] : f32 from vector<1x1x1xf32>
      %123 = arith.divf %117, %122 : f32
      %124 = vector.broadcast %123 : f32 to vector<1x1xf32>
      %c0_48 = arith.constant 0 : index
      %c0_49 = arith.constant 0 : index
      %125 = vector.load %arg5[%c0_48, %c0_49] : memref<1x1xf32, #tpu.memory_space<vmem>>, vector<1x1xf32>
      tpu.vector_store %arg5[%c0_48, %c0_49], %124 {strides = array<i32>} : memref<1x1xf32, #tpu.memory_space<vmem>>, vector<1x1xf32>,
      %c0_50 = arith.constant 0 : index
      %c0_51 = arith.constant 0 : index
      %126 = vector.load %arg9[%c0_50, %c0_51] : memref<8x10xf32, #tpu.memory_space<vmem>>, vector<8x10xf32>
      %127 = vector.shape_cast %126 : vector<8x10xf32> to vector<1x8x10xf32>
      %cst_52 = arith.constant dense<0.000000e+00> : vector<1xf32>
      %128 = vector.multi_reduction <add>, %127, %cst_52 [1, 2] : vector<1x8x10xf32> to vector<1xf32>
      %129 = vector.shape_cast %128 : vector<1xf32> to vector<1x1x1xf32>
      %130 = vector.extract %129[0, 0, 0] : f32 from vector<1x1x1xf32>
      %cst_53 = arith.constant 1.000000e-01 : f32
      %131 = arith.mulf %130, %cst_53 : f32
      %cst_54 = arith.constant 0.000000e+00 : f32
      %cst_55 = arith.constant 1.000000e+00 : f32
      %132 = arith.maximumf %cst_54, %131 : f32
      %133 = arith.minimumf %cst_55, %132 : f32
      %134 = vector.broadcast %133 : f32 to vector<1x1xf32>
      %c0_56 = arith.constant 0 : index
      %c0_57 = arith.constant 0 : index
      %135 = vector.load %arg6[%c0_56, %c0_57] : memref<1x1xf32, #tpu.memory_space<vmem>>, vector<1x1xf32>
      tpu.vector_store %arg6[%c0_56, %c0_57], %134 {strides = array<i32>} : memref<1x1xf32, #tpu.memory_space<vmem>>, vector<1x1xf32>,
    } else {
    }
    return
  }
  func.func @transform_0(%arg0: i32) -> (i32, i32) {
    %c0_i32 = arith.constant 0 : i32
    %c0_i32_0 = arith.constant 0 : i32
    return %arg0, %c0_i32 : i32, i32
  }
  func.func @transform_1(%arg0: i32) -> (i32, i32) {
    %c0_i32 = arith.constant 0 : i32
    %c0_i32_0 = arith.constant 0 : i32
    return %arg0, %c0_i32 : i32, i32
  }
  func.func @transform_2(%arg0: i32) -> (i32, i32) {
    %c0_i32 = arith.constant 0 : i32
    %c0_i32_0 = arith.constant 0 : i32
    %c0_i32_1 = arith.constant 0 : i32
    return %c0_i32, %c0_i32_0 : i32, i32
  }
  func.func @transform_3(%arg0: i32) -> (i32, i32) {
    %c0_i32 = arith.constant 0 : i32
    %c0_i32_0 = arith.constant 0 : i32
    return %arg0, %c0_i32 : i32, i32
  }
  func.func @transform_4(%arg0: i32) -> (i32, i32) {
    %c0_i32 = arith.constant 0 : i32
    %c0_i32_0 = arith.constant 0 : i32
    %c0_i32_1 = arith.constant 0 : i32
    return %c0_i32, %c0_i32_0 : i32, i32
  }
  func.func @transform_5(%arg0: i32) -> (i32, i32) {
    %c0_i32 = arith.constant 0 : i32
    %c0_i32_0 = arith.constant 0 : i32
    %c0_i32_1 = arith.constant 0 : i32
    return %c0_i32, %c0_i32_0 : i32, i32
  }
}

</mosaic_0001>

<bundles_post_ra>
// kernel: tpu_custom_call.1
= control target key start
LH: loop header
LB: loop body
LE: loop exit
PB: predicated region body
PF: predicated region fallthrough
CT: control target
= control target key end

     0   :  { %11 = vsyncpa [#allocation6], 0  ;;  %s937_s0 = inlined_call_operand.vmem [shape: f32[10,10], index: 0, kind: input, shape index: {}]   ;;  %s938_s1 = inlined_call_operand.vmem [shape: s32[10,1], index: 1, kind: input, shape index: {}]   ;;  %s939_s2 = inlined_call_operand.vmem [shape: f32[1,10], index: 2, kind: input, shape index: {}]   ;;  %s940_s3 = inlined_call_operand.hbm [shape: f32[10,10], index: 3, kind: input, shape index: {}]   ;;  %s941_s4 = inlined_call_operand.hbm [shape: f32[1,1], index: 4, kind: output, shape index: {0}]   ;;  %s942_s5 = inlined_call_operand.hbm [shape: f32[1,1], index: 5, kind: output, shape index: {1}]  }
   0x1   :  { %13 = vsyncpa [#allocation6 + $0x1], 0 }
   0x2   :  { %14 = vsyncpa [#allocation7], 0 }
   0x3   :  { %15 = vsyncpa [#allocation10], 0  ;;  %s780_s18 = smov 0   ;;  %s782_s19 = smov 0  }
   0x4   :  { %s784_s20 = smov 0   ;;  %s786_s21 = smov 0  }
   0x5 LB: > { %s799_s22 = sadd.s32 4294967295, %s741_s21   ;;  %s802_s23 = sadd.s32 1, %s741_s21   ;;  %s741_s21 = sphi %s786_s21, %s952_s21   ;;  %s737_s20 = sphi %s784_s20, %s951_s20   ;;  %s733_s19 = sphi %s782_s19, %s950_s19   ;;  %s729_s18 = sphi %s780_s18, %s949_s18  }
   0x6   : > { %s98_s24 = ssub.s32 %s741_s21, %s802_s23  ;;  %s101_s25 = sadd.s32 1, %s737_s20 }
   0x7   : > { %p99_p0 = scmp.eq.s32.totalorder %s98_s24, 0  ;;  %p108_p1 = scmp.ne.s32.totalorder %s737_s20, %s733_s19 }
   0x8   : > { %p109_p2 = scmp.eq.s32.totalorder %s741_s21, 0  ;;  %p114_p3 = scmp.ne.s32.totalorder %s733_s19, %s729_s18 }
   0x9   : > { %s812_s26 = scalar_select %p99_p0, %s737_s20, %s101_s25  }
   0xa   : > { %p110_p4 = por %p109_p2, %p108_p1  ;;  %p115_p5 = scmp.eq.s32.totalorder %s799_s22, 0 }
   0xb   : > { %p558_p6 = scmp.lt.s32.totalorder %s741_s21, 2  ;;  %s197_s28 = sand.u32 1, %s737_s20  }
   0xc   : > { %p816_p7 = por %p115_p5, %p114_p3  ;;  %s520_s29 = sshll.u32 %s197_s28, 3 }
   0xd   : > { %s521_s30 = sshll.u32 %s741_s21, 7  ;;  %s201_s9 = scalar_lea.vmem [#allocation5], %s520_s29 }
   0xe   : > { %s944_s27 = scalar_select %p816_p7, 1, 0 }
   0xf   : > { %s825_s8 = scalar_lea.hbm %s940_s3, %s521_s30  ;;  %s208_s10 = sshll.u32 %s201_s9, 4  ;;  %s827_s10 = int_to_ptr.vmem [resolvable:$true] %s208_s10 }
  0x10   : > { %p829_p8 = pnand %p558_p6, %p110_p4  ;;  %s198_s12 = scalar_lea.sflag [#allocation6], %s197_s28 }
  0x11   : > { %s623_s13 = scalar_lea.hbm %s825_s8, 128  ;;  %s628_s16 = scalar_lea.hbm %s940_s3, 256 }
  0x12   : > { %p624_p11 = scmp.ne.s32.totalorder %s825_s8, %s623_s13  ;;  %p625_p12 = pneg %p829_p8 }
  0x13   : > { %p629_p1 = scmp.lt.s32.totalorder %s825_s8, %s940_s3  ;;  %p630_p2 = scmp.lt.s32.totalorder %s628_s16, %s623_s13 }
  0x14   : > { %p626_p13 = pnand %p625_p12, %p624_p11 }
  0x15   : > { %p631_p3 = por %p630_p2, %p629_p1 }
  0x16   : > { %p627_p0 = pneg %p626_p13 }
  0x18   : > { %p632_p4 = pnand %p631_p3, %p627_p0 }
  0x1a   : > { %635 = shalt.err (!%p632_p4)
}
  0x1b   : > { %s636_s24 = scalar_lea.vmem %s827_s10, 128  ;;  %s743_s25 = smov [#allocation5]  }
  0x1c   : > { %p637_p5 = scmp.ne.s32.totalorder %s827_s10, %s636_s24  ;;  %s641_s28 = sshll.u32 %s743_s25, 4  ;;  %s642_s28 = int_to_ptr.vmem [resolvable:$false] %s641_s28 }
  0x1d   : > { %s643_s29 = scalar_lea.vmem %s642_s28, 256  ;;  %p644_p13 = scmp.lt.s32.totalorder %s827_s10, %s642_s28 }
  0x1e   : > { %p639_p6 = pnand %p637_p5, %p625_p12  ;;  %p645_p9 = scmp.lt.s32.totalorder %s643_s29, %s636_s24 }
  0x20   : > { %p640_p11 = pneg %p639_p6  ;;  %p646_p10 = por %p645_p9, %p644_p13 }
  0x22   : > { %p647_p7 = pnand %p646_p10, %p640_p11 }
  0x24   : > { %650 = shalt.err (!%p647_p7)
}
  0x25   : > { %557 = dma.hbm_to_vmem [thread:$0]  (!%p829_p8), %s825_s8, 128, %s827_s10, %s198_s12  }
  0x26   : > { %p946_p0 = scmp.lt.s32.totalorder %s741_s21, 3  ;;  %p947_p1 = scmp.ge.s32.totalorder %s741_s21, 1 }
  0x28   : > { %p214_p12 = pnand %p947_p1, %p946_p0 }
  0x29   : > { %s219_s30 = sand.u32 (!%p214_p12), 1, %s733_s19   ;;  %p948_p9 = scmp.ne.s32.totalorder (!%p214_p12), %s944_s27, 0 }
  0x2a   : > { %217 = sbr.rel (%p214_p12) target bundleno = 723 (0x2d3), region = 36  ;;  %s523_s6 = sshll.u32 (!%p214_p12), %s219_s30, 3 }
  0x2b   : > { %s220_s7 = scalar_lea.sflag (!%p214_p12), [#allocation6], %s219_s30  ;;  %s223_s9 = scalar_lea.vmem (!%p214_p12), [#allocation5], %s523_s6 }
  0x2f   : > { %716 = dma.done.wait (%p948_p9), %s220_s7, 128  }
  0x30   : > { %718 = vsyncadd (%p948_p9), %s220_s7, 4294967168  ;;  %p253_p7 = scmp.lt.s32.totalorder %s799_s22, 1  ;;  %p526_p8 = scmp.ne.s32.totalorder %s799_s22, 0 }
  0x32   : > { %s254_s11 = scalar_select %p253_p7, %s799_s22, 1 }
  0x33   : > { %264 = sbr.rel (%p526_p8) target bundleno = 59 (0x3b), region = 44 }
  0x34   : > { %s524_s8 = sshll.u32 %s254_s11, 3 }
  0x35   : > { %s256_s12 = scalar_lea.vmem %s937_s0, %s524_s8  ;;  %s870_s15 = scalar_lea.vmem %s938_s1, %s524_s8 }
  0x38   : > { %vm265_vm0 = vcmask 80896   ;;  %v744_v0 = vmov 0.0  }
  0x39   : > { %266 = vst.msk [vmem:[#allocation2] sm:$0xff] %vm265_vm0, %v744_v0  ;;  %267 = vst.msk [vmem:[#allocation3] sm:$0xff] %vm265_vm0, %v744_v0 }
  0x3a   : > { %268 = vst.msk [vmem:[#allocation4] sm:$0xff] %vm265_vm0, %v744_v0 }
  0x3b PF: > { %v270_v1 = vlaneseq  ;;  %s527_s27 = sshll.u32 %s799_s22, 3  ;;  %v269_v4 = vld [vmem:[%s256_s12] sm:$0xff]  ;;  %vm281_vm1 = vcmask 80896   ;;  %v745_v11 = vmov 0   ;;  %p529_p10 = scmp.ne.s32.totalorder %s799_s22, 1 }
  0x3c   : > { %v273_v2 = vstv %s527_s27  ;;  %v318_v6 = vld [vmem:[%s223_s9] sm:$0xff]  ;;  %601 = vset.pattern.permute.xlu1 %v745_v11  ;;  %602 = vset.pattern.permute.xlu0 %v745_v11  ;;  %s746_s6 = smov (!%p529_p10), 0.0   ;;  %s747_s9 = smov (!%p529_p10), 1.0  }
  0x3d   : > { %v271_v3 = vshrl.u32 %v270_v1, 7  ;;  %v279_v27 = vld [vmem:[%s870_s15] sm:$0xff]  ;;  %v295_v31 = vand.u32 127, %v270_v1 }
  0x3e   : > { %v528_v32 = vld [vmem:[%s939_s2] ss:$0 sm:$0xff] }
  0x3f   : > { %v874_v5 = vadd.s32 %v273_v2, %v271_v3 }
  0x40   : > { %v314_v34 = vld [vmem:[#allocation3] sm:$0xff]  ;;  %v310_v43 = vld [vmem:[#allocation2] sm:$0xff] }
  0x41   : > { %vm275_vm2 = vcmp.lt.s32.totalorder %v874_v5, 10  ;;  %v361_v3 = vld [vmem:[#allocation4] sm:$0xff] }
  0x42   : > { %v278_v7 = vsel %vm275_vm2, %v269_v4, 0.0  ;;  %v319_v8 = vsel %vm275_vm2, %v318_v6, 0.0 }
  0x43   : > { %v282_v9 = vsel %vm281_vm1, %v278_v7, -inf  ;;  %v333_v10 = vsel %vm281_vm1, %v319_v8, -inf }
  0x44   : > { %283 = vmax.xlane.f32.xlu0 %v282_v9 }
  0x48   : > { %334 = vmax.xlane.f32.xlu0 %v333_v10 }
  0xcd   : > { %v284_v12 = vpop.xlane.xlu0 %283 }
  0xce   : > { %v285_v13 = vsub.f32 %v278_v7, %v284_v12 }
  0xd0   : > { %v286_v14 = vmul.f32 1.442695, %v285_v13  ;;  %v320_v15 = vmul.f32 0.33333334, %v285_v13 }
  0xd1   : > { %v335_v16 = vpop.xlane.xlu0 %334 }
  0xd2   : > { %603 = vpow2.f32 %v286_v14  ;;  %v321_v17 = vmul.f32 1.442695, %v320_v15  ;;  %v336_v18 = vsub.f32 %v319_v8, %v335_v16 }
  0xd4   : > { %605 = vpow2.f32 %v321_v17  ;;  %v337_v19 = vmul.f32 0.33333334, %v336_v18 }
  0xd6   : > { %v338_v20 = vmul.f32 1.442695, %v337_v19 }
  0xd8   : > { %607 = vpow2.f32 %v338_v20 }
  0xdf   : > { %v604_v21 = vpop.eup %603 }
  0xe0   : > { %v288_v22 = vsel %vm281_vm1, %v604_v21, 0.0 }
  0xe1   : > { %v606_v23 = vpop.eup %605  ;;  %289 = vadd.xlane.f32.xlu0 %v288_v22 }
  0xe2   : > { %v323_v24 = vsel %vm281_vm1, %v606_v23, 0.0 }
  0xe3   : > { %324 = vadd.xlane.f32.xlu1 %v323_v24 }
  0xe5   : > { %v608_v25 = vpop.eup %607 }
  0xe6   : > { %v340_v26 = vsel %vm281_vm1, %v608_v25, 0.0 }
  0xe7   : > { %341 = vadd.xlane.f32.xlu1 %v340_v26 }
  0xf8   : > { %297 = vperm.xlu1 %601, %v279_v27  }
 0x16a   : > { %v290_v28 = vpop.xlane.xlu0 %289 }
 0x16b   : > { %609 = vlog2.f32 %v290_v28 }
 0x16c   : > { %v325_v29 = vpop.xlane.xlu1 %324 }
 0x16d   : > { %611 = vrcp.f32 %v325_v29 }
 0x170   : > { %v342_v30 = vpop.xlane.xlu1 %341 }
 0x171   : > { %613 = vrcp.f32 %v342_v30 }
 0x172   : > { %615 = vlog2.f32 %v342_v30 }
 0x173   : > { %617 = vlog2.f32 %v325_v29 }
 0x174   : > { %v298_v33 = vpop.permute.xlu1 %297 }
 0x175   : > { %vm299_vm3 = vcmp.eq.s32.totalorder %v295_v31, %v298_v33 }
 0x176   : > { %vm300_vm4 = vmand %vm299_vm3, %vm275_vm2 }
 0x177   : > { %v307_v35 = vsel %vm300_vm4, %v528_v32, 0.0 }
 0x178   : > { %v610_v36 = vpop.eup %609  ;;  %v316_v37 = vadd.f32 %v314_v34, %v307_v35 }
 0x179   : > { %v292_v38 = vmul.f32 0.6931472, %v610_v36 }
 0x17a   : > { %317 = vst.msk [vmem:[#allocation3] sm:$0xff] %vm281_vm1, %v316_v37  ;;  %v612_v40 = vpop.eup %611 }
 0x17b   : > { %v293_v39 = vadd.f32 %v292_v38, %v284_v12  ;;  %v327_v44 = vmul.f32 %v612_v40, %v606_v23 }
 0x17d   : > { %v308_v41 = vsub.f32 %v293_v39, %v278_v7 }
 0x17e   : > { %v614_v42 = vpop.eup %613 }
 0x17f   : > { %v344_v45 = vmul.f32 %v614_v42, %v608_v25  ;;  %v309_v46 = vmul.f32 %v308_v41, %v307_v35  ;;  %v616_v47 = vpop.eup %615 }
 0x180   : > { %v618_v50 = vpop.eup %617  ;;  %v346_v51 = vmul.f32 0.6931472, %v616_v47 }
 0x181   : > { %v350_v48 = vadd.f32 %v344_v45, %v327_v44  ;;  %v312_v49 = vadd.f32 %v310_v43, %v309_v46  ;;  %v329_v53 = vmul.f32 0.6931472, %v618_v50 }
 0x182   : > { %v347_v55 = vsub.f32 %v337_v19, %v346_v51 }
 0x183   : > { %v351_v52 = vmul.f32 0.5, %v350_v48  ;;  %313 = vst.msk [vmem:[#allocation2] sm:$0xff] %vm281_vm1, %v312_v49  ;;  %v330_v57 = vsub.f32 %v320_v15, %v329_v53 }
 0x184   : > { %v348_v58 = vmax.f32 %v347_v55, -4.6051702 }
 0x185   : > { %v352_v54 = vmax.f32 %v351_v52, 0.01  ;;  %v331_v59 = vmax.f32 %v330_v57, -4.6051702 }
 0x186   : > { %v349_v60 = vmin.f32 %v348_v58, -0.010050336 }
 0x187   : > { %v353_v56 = vmin.f32 %v352_v54, 0.99  ;;  %v332_v61 = vmin.f32 %v331_v59, -0.010050336 }
 0x189   : > { %619 = vlog2.f32 %v353_v56  ;;  %v356_v62 = vadd.f32 %v349_v60, %v332_v61 }
 0x18b   : > { %v357_v1 = vmul.f32 0.5, %v356_v62 }
 0x196   : > { %v620_v63 = vpop.eup %619 }
 0x197   : > { %v355_v0 = vmul.f32 0.6931472, %v620_v63 }
 0x199   : > { %v358_v2 = vsub.f32 %v355_v0, %v357_v1 }
 0x19b   : > { %v359_v4 = vmul.f32 %v358_v2, %v353_v56 }
 0x19c   : > { %368 = sbr.rel (%p529_p10) target bundleno = 695 (0x2b7), region = 48 }
 0x19d   : > { %v360_v6 = vsel %vm275_vm2, %v359_v4, 0.0 }
 0x19e   : > { %v363_v7 = vadd.f32 %v361_v3, %v360_v6 }
 0x1a0   : > { %364 = vst.msk [vmem:[#allocation4] sm:$0xff] %vm281_vm1, %v363_v7 }
 0x1a1   : > { %v369_v8 = vld [vmem:[#allocation2] sm:$0xff]  ;;  %v380_v9 = vld [vmem:[#allocation3] sm:$0xff]  ;;  %vm396_vm5 = vcmask 0  }
 0x1a2   : > { %v370_v11 = vsel %vm281_vm1, %v369_v8, 0.0  ;;  %v381_v13 = vsel %vm281_vm1, %v380_v9, 0.0 }
 0x1a3   : > { %371 = vadd.xlane.f32.xlu0 %v370_v11 }
 0x1a7   : > { %v398_v10 = vld [vmem:[#allocation4] sm:$0xff]  ;;  %382 = vadd.xlane.f32.xlu0 %v381_v13 }
 0x1a8   : > { %v399_v12 = vsel %vm281_vm1, %v398_v10, 0.0 }
 0x1a9   : > { %400 = vadd.xlane.f32.xlu1 %v399_v12 }
 0x22c   : > { %v372_v5 = vpop.xlane.xlu0 %371 }
 0x22d   : > { %v373_v14 = vrot.slane %v372_v5, 4 }
 0x22f   : > { %v374_v15 = vadd.f32 %v373_v14, %v372_v5 }
 0x230   : > { %v383_v16 = vpop.xlane.xlu0 %382 }
 0x231   : > { %v375_v17 = vrot.slane %v374_v15, 2  ;;  %v384_v18 = vrot.slane %v383_v16, 4 }
 0x232   : > { %v401_v27 = vpop.xlane.xlu1 %400 }
 0x233   : > { %v385_v19 = vadd.f32 %v384_v18, %v383_v16  ;;  %v376_v20 = vadd.f32 %v375_v17, %v374_v15  ;;  %v402_v28 = vrot.slane %v401_v27, 4 }
 0x235   : > { %v386_v21 = vrot.slane %v385_v19, 2  ;;  %v377_v22 = vrot.slane %v376_v20, 1  ;;  %v403_v29 = vadd.f32 %v402_v28, %v401_v27 }
 0x237   : > { %v387_v23 = vadd.f32 %v386_v21, %v385_v19  ;;  %v378_v24 = vadd.f32 %v377_v22, %v376_v20  ;;  %v404_v31 = vrot.slane %v403_v29, 2 }
 0x239   : > { %536 = vpush %v378_v24  ;;  %v388_v25 = vrot.slane %v387_v23, 1  ;;  %v405_v32 = vadd.f32 %v404_v31, %v403_v29 }
 0x23b   : > { %v389_v26 = vadd.f32 %v388_v25, %v387_v23  ;;  %v406_v33 = vrot.slane %v405_v32, 1 }
 0x23d   : > { %538 = vpush %v389_v26  ;;  %v407_v35 = vadd.f32 %v406_v33, %v405_v32 }
 0x26a   : > { %s537_s18 = spop %536 }
 0x26e   : > { %s539_s24 = spop %538 }
 0x26f   : > { %v391_v30 = vstv %s539_s24 }
 0x270   : > { %621 = vrcp.f32 %v391_v30 }
 0x27d   : > { %v622_v34 = vpop.eup %621 }
 0x27e   : > { %540 = vpush %v622_v34 }
 0x27f   : > { %542 = vpush %v407_v35 }
 0x2af   : > { %s541_s25 = spop %540 }
 0x2b0   : > { %s394_s28 = smul.f32 %s541_s25, %s537_s18  ;;  %s543_s29 = spop %542 }
 0x2b1   : > { %s409_s30 = smul.f32 0.1, %s543_s29 }
 0x2b2   : > { %v395_v36 = vstv %s394_s28 }
 0x2b3   : > { %397 = vst.msk [vmem:[#allocation8] sm:$0x1] %vm396_vm5, %v395_v36  ;;  %s410_s7 = smax.f32 %s746_s6, %s409_s30 }
 0x2b4   : > { %s411_s11 = smin.f32 %s747_s9, %s410_s7 }
 0x2b5   : > { %v412_v37 = vstv %s411_s11 }
 0x2b6   : > { %413 = vst.msk [vmem:[#allocation9] sm:$0x1] %vm396_vm5, %v412_v37 }
 0x2b7 PF: > { %p559_p2 = scmp.eq.s32.totalorder %s799_s22, 1  ;;  %s748_s8 = smov [#allocation8]  }
 0x2b8   : > { %s421_s10 = sshll.u32 %s748_s8, 4  ;;  %s749_s21 = smov [#allocation9]   ;;  %s422_s10 = int_to_ptr.vmem [resolvable:$true] %s421_s10 }
 0x2b9   : > { %s432_s12 = sshll.u32 %s749_s21, 4  ;;  %s651_s13 = scalar_lea.vmem %s422_s10, 16  ;;  %s433_s12 = int_to_ptr.vmem [resolvable:$true] %s432_s12 }
 0x2ba   : > { %p652_p3 = scmp.ne.s32.totalorder %s422_s10, %s651_s13  ;;  %s657_s14 = scalar_lea.vmem %s422_s10, 32 }
 0x2bb   : > { %p658_p6 = scmp.lt.s32.totalorder %s422_s10, %s422_s10  ;;  %p659_p11 = scmp.lt.s32.totalorder %s657_s14, %s651_s13 }
 0x2bc   : > { %p653_p4 = pnand %p652_p3, %p559_p2 }
 0x2bd   : > { %p660_p13 = por %p659_p11, %p658_p6 }
 0x2be   : > { %p654_p5 = pneg %p653_p4 }
 0x2c0   : > { %p661_p0 = pnand %p660_p13, %p654_p5 }
 0x2c2   : > { %664 = shalt.err (!%p661_p0)
}
 0x2c3   : > { %547 = dma.vmem_to_hbm [thread:$0]  (%p559_p2), %s422_s10, 16, %s941_s4, [#allocation7]  }
 0x2c4   : > { %s675_s16 = scalar_lea.vmem %s433_s12, 16  ;;  %s681_s17 = scalar_lea.vmem %s433_s12, 32 }
 0x2c5   : > { %p676_p1 = scmp.ne.s32.totalorder %s433_s12, %s675_s16  ;;  %p682_p7 = scmp.lt.s32.totalorder %s433_s12, %s433_s12 }
 0x2c6   : > { %p683_p8 = scmp.lt.s32.totalorder %s681_s17, %s675_s16 }
 0x2c7   : > { %p677_p12 = pnand %p676_p1, %p559_p2 }
 0x2c8   : > { %p684_p10 = por %p683_p8, %p682_p7 }
 0x2c9   : > { %p678_p9 = pneg %p677_p12 }
 0x2cb   : > { %p685_p3 = pnand %p684_p10, %p678_p9 }
 0x2cd   : > { %688 = shalt.err (!%p685_p3)
}
 0x2ce   : > { %549 = dma.vmem_to_hbm [thread:$0]  (%p559_p2), %s433_s12, 16, %s942_s5, [#allocation10]  }
 0x2cf   : > { %720 = dma.done.wait (%p559_p2), [#allocation7], 16  }
 0x2d0   : > { %722 = vsyncadd (%p559_p2), [#allocation7], 4294967280 }
 0x2d1   : > { %724 = dma.done.wait (%p559_p2), [#allocation10], 16  }
 0x2d2   : > { %726 = vsyncadd (%p559_p2), [#allocation10], 4294967280 }
 0x2d3 PF: > { %p18_p4 = scmp.ge.s32.totalorder %s802_s23, 4   ;;  %s949_s18 = smov %s733_s19 }
 0x2d4   : > { %s950_s19 = smov %s737_s20  ;;  %s951_s20 = smov %s812_s26 }
 0x2d5   : > { %s952_s21 = smov %s802_s23  ;;  %20 = sbr.rel (!%p18_p4) target bundleno = 5 (0x5), region = 95 }
 0x2da   :  { %449 = vsyncpa [#allocation6], 1 }
 0x2db   :  { %451 = vsyncpa [#allocation6 + $0x1], 1 }
 0x2dc   :  { %452 = vsyncpa [#allocation7], 1 }
 0x2dd   :  { %454 = vsyncpa [#allocation7 + $0x1], 1 }
 0x2de   :  { %455 = vsyncpa [#allocation10], 1 }

</bundles_post_ra>
